<compile_context>
chip_gen: v7x
topology: tpu7x:2x2x1
jax: 0.10.0
libtpu: 0.0.40
codegen_flags: <defaults>
</compile_context>

<pallas_src>
import functools

import jax
import jax.numpy as jnp
import numpy as np
from jax import lax
from jax.experimental import pallas as pl
from jax.experimental.pallas import tpu as pltpu

IN_DIM = 128
HIDDEN_DIM = 128
DEPTH = 2
N_ASSETS = 8
BATCH = 8
LN_EPS = 1e-5


def _mish(v):
    # mish(x) = x * tanh(softplus(x)), softplus computed stably.
    sp = jnp.maximum(v, 0.0) + jnp.log1p(jnp.exp(-jnp.abs(v)))
    return v * jnp.tanh(sp)


def _actor_kernel(x_ref, w_ref, v_ref, head_ref, out_ref, *, depth, n_assets):
    x = x_ref[...]                      # (tile_b, in_dim), already f32
    in_dim = x.shape[-1]
    inv_d = 1.0 / in_dim

    # Residual MLP blocks (depth static -> unrolled, keeps LLO visibility).
    for i in range(depth):
        residual = x
        lnw = v_ref[4 * i + 0]
        lnb = v_ref[4 * i + 1]
        b1 = v_ref[4 * i + 2]
        b2 = v_ref[4 * i + 3]

        # Single-pass LayerNorm: two independent lane reductions.
        s1 = jnp.sum(x, axis=-1, keepdims=True)
        s2 = jnp.sum(x * x, axis=-1, keepdims=True)
        mean = s1 * inv_d
        var = jnp.maximum(s2 * inv_d - mean * mean, 0.0)
        h = (x - mean) * lax.rsqrt(var + LN_EPS)
        h = h * lnw + lnb

        # linear1 -> mish -> linear2 (dropout is identity in eval mode)
        h = _mish(jnp.dot(h, w_ref[2 * i + 0],
                          preferred_element_type=jnp.float32) + b1)
        h = jnp.dot(h, w_ref[2 * i + 1],
                    preferred_element_type=jnp.float32) + b2
        x = _mish(h + residual)

    # Fused heads: one (in_dim, 2*n_assets) matmul, then per-lane tanh/sigmoid.
    wh = head_ref[:in_dim, :]                       # (in_dim, 2*n_assets)
    bh = head_ref[in_dim:in_dim + 1, :]             # (1, 2*n_assets)
    y = jnp.dot(x, wh, preferred_element_type=jnp.float32) + bh
    col = lax.broadcasted_iota(jnp.int32, y.shape, 1)
    out = jnp.where(col < n_assets, jnp.tanh(y), jax.nn.sigmoid(y))
    out_ref[...] = out.astype(out_ref.dtype)


def actor_forward(x, packed, *, tile_b=None):
    """x: (B, IN_DIM) float32. Returns (B, 2 * N_ASSETS) float32."""
    w_slab, v_slab, head_slab = packed
    B, in_dim = x.shape
    out_dim = head_slab.shape[-1]
    if tile_b is None:
        tile_b = B if B <= 256 else 256
    assert B % tile_b == 0 and tile_b % 8 == 0, "batch must tile in multiples of 8"

    kernel = functools.partial(_actor_kernel, depth=DEPTH, n_assets=N_ASSETS)
    return pl.pallas_call(
        kernel,
        out_shape=jax.ShapeDtypeStruct((B, out_dim), jnp.float32),
        grid_spec=pltpu.PrefetchScalarGridSpec(
            num_scalar_prefetch=0,
            grid=(B // tile_b,),
            in_specs=[
                pl.BlockSpec((tile_b, in_dim), lambda i: (i, 0)),
                pl.BlockSpec(w_slab.shape, lambda i: (0, 0, 0)),
                pl.BlockSpec(v_slab.shape, lambda i: (0, 0)),
                pl.BlockSpec(head_slab.shape, lambda i: (0, 0)),
            ],
            out_specs=pl.BlockSpec((tile_b, out_dim), lambda i: (i, 0)),
        ),
        compiler_params=pltpu.CompilerParams(
            dimension_semantics=("parallel",)),
    )(x, w_slab, v_slab, head_slab)


def init_params(key):
    """Unpacked, PyTorch-layout-equivalent params (weights pre-transposed to (in, out))."""
    ks = jax.random.split(key, 10)
    s = 0.05
    lnw = jnp.ones((DEPTH, IN_DIM), jnp.float32)
    lnb = jnp.zeros((DEPTH, IN_DIM), jnp.float32)
    w1 = jax.random.normal(ks[0], (DEPTH, IN_DIM, HIDDEN_DIM), jnp.float32) * s
    b1 = jax.random.normal(ks[1], (DEPTH, HIDDEN_DIM), jnp.float32) * s
    w2 = jax.random.normal(ks[2], (DEPTH, HIDDEN_DIM, IN_DIM), jnp.float32) * s
    b2 = jax.random.normal(ks[3], (DEPTH, IN_DIM), jnp.float32) * s
    wp = jax.random.normal(ks[4], (IN_DIM, N_ASSETS), jnp.float32) * s
    bp = jax.random.normal(ks[5], (1, N_ASSETS), jnp.float32) * s
    wq = jax.random.normal(ks[6], (IN_DIM, N_ASSETS), jnp.float32) * s
    bq = jax.random.normal(ks[7], (1, N_ASSETS), jnp.float32) * s
    return (lnw, lnb, w1, b1, w2, b2, wp, bp, wq, bq)


def pack_params(params):
    """Collapse the 10 parameter tensors into 3 slabs (3 HBM->VMEM DMAs)."""
    (lnw, lnb, w1, b1, w2, b2, wp, bp, wq, bq) = params
    # (DEPTH*2, IN_DIM, IN_DIM): [w1_0, w2_0, w1_1, w2_1]   (IN_DIM == HIDDEN_DIM)
    w_rows = []
    v_rows = []
    for i in range(DEPTH):
        w_rows.append(w1[i])
        w_rows.append(w2[i])
        v_rows.extend([lnw[i], lnb[i], b1[i], b2[i]])
    w_slab = jnp.stack(w_rows, axis=0)                       # (DEPTH*2, 128, 128)
    v_slab = jnp.stack(v_rows, axis=0)                       # (DEPTH*4, 128)
    wh = jnp.concatenate([wp, wq], axis=1)                   # (128, 2*N_ASSETS)
    bh = jnp.concatenate([bp, bq], axis=1)                   # (1, 2*N_ASSETS)
    pad = jnp.zeros((7, 2 * N_ASSETS), jnp.float32)          # pad rows -> multiple of 8
    head_slab = jnp.concatenate([wh, bh, pad], axis=0)       # (136, 2*N_ASSETS)
    return (w_slab, v_slab, head_slab)


def reference_forward(x, params):
    """Pure-JAX reference of the same forward pass for correctness check."""
    (lnw, lnb, w1, b1, w2, b2, wp, bp, wq, bq) = params

    def mish(v):
        sp = jnp.maximum(v, 0.0) + jnp.log1p(jnp.exp(-jnp.abs(v)))
        return v * jnp.tanh(sp)

    h = x
    for i in range(DEPTH):
        res = h
        mean = jnp.mean(h, axis=-1, keepdims=True)
        var = jnp.mean((h - mean) ** 2, axis=-1, keepdims=True)
        n = (h - mean) / jnp.sqrt(var + LN_EPS) * lnw[i] + lnb[i]
        n = mish(n @ w1[i] + b1[i])
        n = n @ w2[i] + b2[i]
        h = mish(n + res)
    price = jnp.tanh(h @ wp + bp)
    qty = jax.nn.sigmoid(h @ wq + bq)
    return jnp.concatenate([price, qty], axis=-1)


if __name__ == "__main__":
    key = jax.random.PRNGKey(0)
    kx, kp = jax.random.split(key)
    x = jax.random.normal(kx, (BATCH, IN_DIM), jnp.float32)
    params = init_params(kp)
    packed = pack_params(params)

    out = actor_forward(x, packed)
    out = jax.block_until_ready(out)

    ref = jax.block_until_ready(reference_forward(x, params))
    assert out.shape == (BATCH, 2 * N_ASSETS)
    np.testing.assert_allclose(np.asarray(out), np.asarray(ref), rtol=1e-4, atol=1e-4)
    print("KERNEL_OK")
</pallas_src>

<mosaic_0001>
module attributes {stable_mosaic.version = 11 : i64} {
  func.func @_actor_kernel(%arg0: i32, %arg1: memref<8x128xf32, #tpu.memory_space<vmem>>, %arg2: memref<4x128x128xf32, #tpu.memory_space<vmem>>, %arg3: memref<8x128xf32, #tpu.memory_space<vmem>>, %arg4: memref<136x16xf32, #tpu.memory_space<vmem>>, %arg5: memref<8x16xf32, #tpu.memory_space<vmem>>) attributes {dimension_semantics = [#tpu.dimension_semantics<parallel>], iteration_bounds = array<i64: 1>, scalar_prefetch = 0 : i64, scratch_operands = 0 : i64, tpu.core_type = #tpu.core_type<tc>, window_params = [{transform_indices = @transform_0, window_bounds = array<i64: 8, 128>}, {pipeline_mode = #tpu.pipeline_mode<synchronous>, transform_indices = @transform_1, window_bounds = array<i64: 4, 128, 128>}, {pipeline_mode = #tpu.pipeline_mode<synchronous>, transform_indices = @transform_2, window_bounds = array<i64: 8, 128>}, {pipeline_mode = #tpu.pipeline_mode<synchronous>, transform_indices = @transform_3, window_bounds = array<i64: 136, 16>}, {transform_indices = @transform_4, window_bounds = array<i64: 8, 16>}]} {
    %c0 = arith.constant 0 : index
    %c0_0 = arith.constant 0 : index
    %0 = vector.load %arg1[%c0, %c0_0] : memref<8x128xf32, #tpu.memory_space<vmem>>, vector<8x128xf32>
    %c0_1 = arith.constant 0 : index
    %c0_2 = arith.constant 0 : index
    %1 = vector.load %arg3[%c0_1, %c0_2] : memref<8x128xf32, #tpu.memory_space<vmem>>, vector<1x128xf32>
    %2 = vector.shape_cast %1 : vector<1x128xf32> to vector<128xf32>
    %c1 = arith.constant 1 : index
    %c0_3 = arith.constant 0 : index
    %3 = vector.load %arg3[%c1, %c0_3] : memref<8x128xf32, #tpu.memory_space<vmem>>, vector<1x128xf32>
    %4 = vector.shape_cast %3 : vector<1x128xf32> to vector<128xf32>
    %c2 = arith.constant 2 : index
    %c0_4 = arith.constant 0 : index
    %5 = vector.load %arg3[%c2, %c0_4] : memref<8x128xf32, #tpu.memory_space<vmem>>, vector<1x128xf32>
    %6 = vector.shape_cast %5 : vector<1x128xf32> to vector<128xf32>
    %c3 = arith.constant 3 : index
    %c0_5 = arith.constant 0 : index
    %7 = vector.load %arg3[%c3, %c0_5] : memref<8x128xf32, #tpu.memory_space<vmem>>, vector<1x128xf32>
    %8 = vector.shape_cast %7 : vector<1x128xf32> to vector<128xf32>
    %cst = arith.constant dense<0.000000e+00> : vector<8xf32>
    %9 = vector.multi_reduction <add>, %0, %cst [1] : vector<8x128xf32> to vector<8xf32>
    %10 = vector.shape_cast %9 : vector<8xf32> to vector<8x1xf32>
    %11 = arith.mulf %0, %0 : vector<8x128xf32>
    %cst_6 = arith.constant dense<0.000000e+00> : vector<8xf32>
    %12 = vector.multi_reduction <add>, %11, %cst_6 [1] : vector<8x128xf32> to vector<8xf32>
    %13 = vector.shape_cast %12 : vector<8xf32> to vector<8x1xf32>
    %cst_7 = arith.constant 7.812500e-03 : f32
    %14 = vector.broadcast %cst_7 : f32 to vector<8x1xf32>
    %15 = arith.mulf %10, %14 : vector<8x1xf32>
    %cst_8 = arith.constant 7.812500e-03 : f32
    %16 = vector.broadcast %cst_8 : f32 to vector<8x1xf32>
    %17 = arith.mulf %13, %16 : vector<8x1xf32>
    %18 = arith.mulf %15, %15 : vector<8x1xf32>
    %19 = arith.subf %17, %18 : vector<8x1xf32>
    %cst_9 = arith.constant 0.000000e+00 : f32
    %20 = vector.broadcast %cst_9 : f32 to vector<8x1xf32>
    %21 = arith.maximumf %19, %20 : vector<8x1xf32>
    %22 = vector.broadcast %15 : vector<8x1xf32> to vector<8x128xf32>
    %23 = arith.subf %0, %22 : vector<8x128xf32>
    %cst_10 = arith.constant 9.99999974E-6 : f32
    %24 = vector.broadcast %cst_10 : f32 to vector<8x1xf32>
    %25 = arith.addf %21, %24 : vector<8x1xf32>
    %26 = math.rsqrt %25 : vector<8x1xf32>
    %27 = vector.broadcast %26 : vector<8x1xf32> to vector<8x128xf32>
    %28 = arith.mulf %23, %27 : vector<8x128xf32>
    %29 = vector.shape_cast %2 : vector<128xf32> to vector<1x128xf32>
    %30 = vector.broadcast %29 : vector<1x128xf32> to vector<8x128xf32>
    %31 = arith.mulf %28, %30 : vector<8x128xf32>
    %32 = vector.shape_cast %4 : vector<128xf32> to vector<1x128xf32>
    %33 = vector.broadcast %32 : vector<1x128xf32> to vector<8x128xf32>
    %34 = arith.addf %31, %33 : vector<8x128xf32>
    %c0_11 = arith.constant 0 : index
    %c0_12 = arith.constant 0 : index
    %c0_13 = arith.constant 0 : index
    %35 = vector.load %arg2[%c0_11, %c0_12, %c0_13] : memref<4x128x128xf32, #tpu.memory_space<vmem>>, vector<1x128x128xf32>
    %36 = vector.shape_cast %35 : vector<1x128x128xf32> to vector<128x128xf32>
    %cst_14 = arith.constant dense<0.000000e+00> : vector<8x128xf32>
    %37 = tpu.matmul %34, %36, %cst_14 {dimension_numbers = #tpu.dot_dimension_numbers<[1], [0], [0], [1], [0, 0, 1, 1], [], []>} : vector<8x128xf32>, vector<128x128xf32>, vector<8x128xf32> -> vector<8x128xf32>
    %38 = vector.shape_cast %6 : vector<128xf32> to vector<1x128xf32>
    %39 = vector.broadcast %38 : vector<1x128xf32> to vector<8x128xf32>
    %40 = arith.addf %37, %39 : vector<8x128xf32>
    %cst_15 = arith.constant 0.000000e+00 : f32
    %41 = vector.broadcast %cst_15 : f32 to vector<8x128xf32>
    %42 = arith.maximumf %40, %41 : vector<8x128xf32>
    %43 = math.absf %40 : vector<8x128xf32>
    %cst_16 = arith.constant 0.000000e+00 : f32
    %44 = vector.broadcast %cst_16 : f32 to vector<8x128xf32>
    %45 = arith.subf %44, %43 : vector<8x128xf32>
    %46 = math.exp %45 : vector<8x128xf32>
    %47 = math.log1p %46 : vector<8x128xf32>
    %48 = arith.addf %42, %47 : vector<8x128xf32>
    %49 = math.tanh %48 : vector<8x128xf32>
    %50 = arith.mulf %40, %49 : vector<8x128xf32>
    %c1_17 = arith.constant 1 : index
    %c0_18 = arith.constant 0 : index
    %c0_19 = arith.constant 0 : index
    %51 = vector.load %arg2[%c1_17, %c0_18, %c0_19] : memref<4x128x128xf32, #tpu.memory_space<vmem>>, vector<1x128x128xf32>
    %52 = vector.shape_cast %51 : vector<1x128x128xf32> to vector<128x128xf32>
    %cst_20 = arith.constant dense<0.000000e+00> : vector<8x128xf32>
    %53 = tpu.matmul %50, %52, %cst_20 {dimension_numbers = #tpu.dot_dimension_numbers<[1], [0], [0], [1], [0, 0, 1, 1], [], []>} : vector<8x128xf32>, vector<128x128xf32>, vector<8x128xf32> -> vector<8x128xf32>
    %54 = vector.shape_cast %8 : vector<128xf32> to vector<1x128xf32>
    %55 = vector.broadcast %54 : vector<1x128xf32> to vector<8x128xf32>
    %56 = arith.addf %53, %55 : vector<8x128xf32>
    %57 = arith.addf %56, %0 : vector<8x128xf32>
    %cst_21 = arith.constant 0.000000e+00 : f32
    %58 = vector.broadcast %cst_21 : f32 to vector<8x128xf32>
    %59 = arith.maximumf %57, %58 : vector<8x128xf32>
    %60 = math.absf %57 : vector<8x128xf32>
    %cst_22 = arith.constant 0.000000e+00 : f32
    %61 = vector.broadcast %cst_22 : f32 to vector<8x128xf32>
    %62 = arith.subf %61, %60 : vector<8x128xf32>
    %63 = math.exp %62 : vector<8x128xf32>
    %64 = math.log1p %63 : vector<8x128xf32>
    %65 = arith.addf %59, %64 : vector<8x128xf32>
    %66 = math.tanh %65 : vector<8x128xf32>
    %67 = arith.mulf %57, %66 : vector<8x128xf32>
    %c4 = arith.constant 4 : index
    %c0_23 = arith.constant 0 : index
    %68 = vector.load %arg3[%c4, %c0_23] : memref<8x128xf32, #tpu.memory_space<vmem>>, vector<1x128xf32>
    %69 = vector.shape_cast %68 : vector<1x128xf32> to vector<128xf32>
    %c5 = arith.constant 5 : index
    %c0_24 = arith.constant 0 : index
    %70 = vector.load %arg3[%c5, %c0_24] : memref<8x128xf32, #tpu.memory_space<vmem>>, vector<1x128xf32>
    %71 = vector.shape_cast %70 : vector<1x128xf32> to vector<128xf32>
    %c6 = arith.constant 6 : index
    %c0_25 = arith.constant 0 : index
    %72 = vector.load %arg3[%c6, %c0_25] : memref<8x128xf32, #tpu.memory_space<vmem>>, vector<1x128xf32>
    %73 = vector.shape_cast %72 : vector<1x128xf32> to vector<128xf32>
    %c7 = arith.constant 7 : index
    %c0_26 = arith.constant 0 : index
    %74 = vector.load %arg3[%c7, %c0_26] : memref<8x128xf32, #tpu.memory_space<vmem>>, vector<1x128xf32>
    %75 = vector.shape_cast %74 : vector<1x128xf32> to vector<128xf32>
    %cst_27 = arith.constant dense<0.000000e+00> : vector<8xf32>
    %76 = vector.multi_reduction <add>, %67, %cst_27 [1] : vector<8x128xf32> to vector<8xf32>
    %77 = vector.shape_cast %76 : vector<8xf32> to vector<8x1xf32>
    %78 = arith.mulf %67, %67 : vector<8x128xf32>
    %cst_28 = arith.constant dense<0.000000e+00> : vector<8xf32>
    %79 = vector.multi_reduction <add>, %78, %cst_28 [1] : vector<8x128xf32> to vector<8xf32>
    %80 = vector.shape_cast %79 : vector<8xf32> to vector<8x1xf32>
    %cst_29 = arith.constant 7.812500e-03 : f32
    %81 = vector.broadcast %cst_29 : f32 to vector<8x1xf32>
    %82 = arith.mulf %77, %81 : vector<8x1xf32>
    %cst_30 = arith.constant 7.812500e-03 : f32
    %83 = vector.broadcast %cst_30 : f32 to vector<8x1xf32>
    %84 = arith.mulf %80, %83 : vector<8x1xf32>
    %85 = arith.mulf %82, %82 : vector<8x1xf32>
    %86 = arith.subf %84, %85 : vector<8x1xf32>
    %cst_31 = arith.constant 0.000000e+00 : f32
    %87 = vector.broadcast %cst_31 : f32 to vector<8x1xf32>
    %88 = arith.maximumf %86, %87 : vector<8x1xf32>
    %89 = vector.broadcast %82 : vector<8x1xf32> to vector<8x128xf32>
    %90 = arith.subf %67, %89 : vector<8x128xf32>
    %cst_32 = arith.constant 9.99999974E-6 : f32
    %91 = vector.broadcast %cst_32 : f32 to vector<8x1xf32>
    %92 = arith.addf %88, %91 : vector<8x1xf32>
    %93 = math.rsqrt %92 : vector<8x1xf32>
    %94 = vector.broadcast %93 : vector<8x1xf32> to vector<8x128xf32>
    %95 = arith.mulf %90, %94 : vector<8x128xf32>
    %96 = vector.shape_cast %69 : vector<128xf32> to vector<1x128xf32>
    %97 = vector.broadcast %96 : vector<1x128xf32> to vector<8x128xf32>
    %98 = arith.mulf %95, %97 : vector<8x128xf32>
    %99 = vector.shape_cast %71 : vector<128xf32> to vector<1x128xf32>
    %100 = vector.broadcast %99 : vector<1x128xf32> to vector<8x128xf32>
    %101 = arith.addf %98, %100 : vector<8x128xf32>
    %c2_33 = arith.constant 2 : index
    %c0_34 = arith.constant 0 : index
    %c0_35 = arith.constant 0 : index
    %102 = vector.load %arg2[%c2_33, %c0_34, %c0_35] : memref<4x128x128xf32, #tpu.memory_space<vmem>>, vector<1x128x128xf32>
    %103 = vector.shape_cast %102 : vector<1x128x128xf32> to vector<128x128xf32>
    %cst_36 = arith.constant dense<0.000000e+00> : vector<8x128xf32>
    %104 = tpu.matmul %101, %103, %cst_36 {dimension_numbers = #tpu.dot_dimension_numbers<[1], [0], [0], [1], [0, 0, 1, 1], [], []>} : vector<8x128xf32>, vector<128x128xf32>, vector<8x128xf32> -> vector<8x128xf32>
    %105 = vector.shape_cast %73 : vector<128xf32> to vector<1x128xf32>
    %106 = vector.broadcast %105 : vector<1x128xf32> to vector<8x128xf32>
    %107 = arith.addf %104, %106 : vector<8x128xf32>
    %cst_37 = arith.constant 0.000000e+00 : f32
    %108 = vector.broadcast %cst_37 : f32 to vector<8x128xf32>
    %109 = arith.maximumf %107, %108 : vector<8x128xf32>
    %110 = math.absf %107 : vector<8x128xf32>
    %cst_38 = arith.constant 0.000000e+00 : f32
    %111 = vector.broadcast %cst_38 : f32 to vector<8x128xf32>
    %112 = arith.subf %111, %110 : vector<8x128xf32>
    %113 = math.exp %112 : vector<8x128xf32>
    %114 = math.log1p %113 : vector<8x128xf32>
    %115 = arith.addf %109, %114 : vector<8x128xf32>
    %116 = math.tanh %115 : vector<8x128xf32>
    %117 = arith.mulf %107, %116 : vector<8x128xf32>
    %c3_39 = arith.constant 3 : index
    %c0_40 = arith.constant 0 : index
    %c0_41 = arith.constant 0 : index
    %118 = vector.load %arg2[%c3_39, %c0_40, %c0_41] : memref<4x128x128xf32, #tpu.memory_space<vmem>>, vector<1x128x128xf32>
    %119 = vector.shape_cast %118 : vector<1x128x128xf32> to vector<128x128xf32>
    %cst_42 = arith.constant dense<0.000000e+00> : vector<8x128xf32>
    %120 = tpu.matmul %117, %119, %cst_42 {dimension_numbers = #tpu.dot_dimension_numbers<[1], [0], [0], [1], [0, 0, 1, 1], [], []>} : vector<8x128xf32>, vector<128x128xf32>, vector<8x128xf32> -> vector<8x128xf32>
    %121 = vector.shape_cast %75 : vector<128xf32> to vector<1x128xf32>
    %122 = vector.broadcast %121 : vector<1x128xf32> to vector<8x128xf32>
    %123 = arith.addf %120, %122 : vector<8x128xf32>
    %124 = arith.addf %123, %67 : vector<8x128xf32>
    %cst_43 = arith.constant 0.000000e+00 : f32
    %125 = vector.broadcast %cst_43 : f32 to vector<8x128xf32>
    %126 = arith.maximumf %124, %125 : vector<8x128xf32>
    %127 = math.absf %124 : vector<8x128xf32>
    %cst_44 = arith.constant 0.000000e+00 : f32
    %128 = vector.broadcast %cst_44 : f32 to vector<8x128xf32>
    %129 = arith.subf %128, %127 : vector<8x128xf32>
    %130 = math.exp %129 : vector<8x128xf32>
    %131 = math.log1p %130 : vector<8x128xf32>
    %132 = arith.addf %126, %131 : vector<8x128xf32>
    %133 = math.tanh %132 : vector<8x128xf32>
    %134 = arith.mulf %124, %133 : vector<8x128xf32>
    %c0_45 = arith.constant 0 : index
    %c0_46 = arith.constant 0 : index
    %135 = vector.load %arg4[%c0_45, %c0_46] : memref<136x16xf32, #tpu.memory_space<vmem>>, vector<128x16xf32>
    %c128 = arith.constant 128 : index
    %c0_47 = arith.constant 0 : index
    %136 = vector.load %arg4[%c128, %c0_47] : memref<136x16xf32, #tpu.memory_space<vmem>>, vector<1x16xf32>
    %cst_48 = arith.constant dense<0.000000e+00> : vector<8x16xf32>
    %137 = tpu.matmul %134, %135, %cst_48 {dimension_numbers = #tpu.dot_dimension_numbers<[1], [0], [0], [1], [0, 0, 1, 1], [], []>} : vector<8x128xf32>, vector<128x16xf32>, vector<8x16xf32> -> vector<8x16xf32>
    %138 = vector.broadcast %136 : vector<1x16xf32> to vector<8x16xf32>
    %139 = arith.addf %137, %138 : vector<8x16xf32>
    %140 = tpu.iota {dimensions = array<i32: 1>} : vector<8x16xi32>
    %c8_i32 = arith.constant 8 : i32
    %141 = vector.broadcast %c8_i32 : i32 to vector<8x16xi32>
    %142 = arith.cmpi slt, %140, %141 : vector<8x16xi32>
    %143 = math.tanh %139 : vector<8x16xf32>
    %144 = arith.negf %139 : vector<8x16xf32>
    %145 = math.exp %144 : vector<8x16xf32>
    %cst_49 = arith.constant 1.000000e+00 : f32
    %146 = vector.broadcast %cst_49 : f32 to vector<8x16xf32>
    %147 = arith.addf %146, %145 : vector<8x16xf32>
    %148 = arith.divf %146, %147 : vector<8x16xf32>
    %149 = arith.select %142, %143, %148 : vector<8x16xi1>, vector<8x16xf32>
    %c0_50 = arith.constant 0 : index
    %c0_51 = arith.constant 0 : index
    %150 = vector.load %arg5[%c0_50, %c0_51] : memref<8x16xf32, #tpu.memory_space<vmem>>, vector<8x16xf32>
    tpu.vector_store %arg5[%c0_50, %c0_51], %149 {strides = array<i32>} : memref<8x16xf32, #tpu.memory_space<vmem>>, vector<8x16xf32>,
    return
  }
  func.func @transform_0(%arg0: i32) -> (i32, i32) {
    %c0_i32 = arith.constant 0 : i32
    %c0_i32_0 = arith.constant 0 : i32
    return %arg0, %c0_i32 : i32, i32
  }
  func.func @transform_1(%arg0: i32) -> (i32, i32, i32) {
    %c0_i32 = arith.constant 0 : i32
    %c0_i32_0 = arith.constant 0 : i32
    %c0_i32_1 = arith.constant 0 : i32
    %c0_i32_2 = arith.constant 0 : i32
    return %c0_i32, %c0_i32_0, %c0_i32_1 : i32, i32, i32
  }
  func.func @transform_2(%arg0: i32) -> (i32, i32) {
    %c0_i32 = arith.constant 0 : i32
    %c0_i32_0 = arith.constant 0 : i32
    %c0_i32_1 = arith.constant 0 : i32
    return %c0_i32, %c0_i32_0 : i32, i32
  }
  func.func @transform_3(%arg0: i32) -> (i32, i32) {
    %c0_i32 = arith.constant 0 : i32
    %c0_i32_0 = arith.constant 0 : i32
    %c0_i32_1 = arith.constant 0 : i32
    return %c0_i32, %c0_i32_0 : i32, i32
  }
  func.func @transform_4(%arg0: i32) -> (i32, i32) {
    %c0_i32 = arith.constant 0 : i32
    %c0_i32_0 = arith.constant 0 : i32
    return %arg0, %c0_i32 : i32, i32
  }
}

</mosaic_0001>

<bundles_post_ra>
// kernel: tpu_custom_call.1
= control target key start
LH: loop header
LB: loop body
LE: loop exit
PB: predicated region body
PF: predicated region fallthrough
CT: control target
= control target key end

     0   :  { %9 = vsyncpa [#allocation3], 0  ;;  %s1318_s0 = inlined_call_operand.vmem [shape: f32[8,128], index: 0, kind: input, shape index: {}]   ;;  %s1319_s1 = inlined_call_operand.hbm [shape: f32[4,128,128], index: 1, kind: input, shape index: {}]   ;;  %s1320_s2 = inlined_call_operand.vmem [shape: f32[8,128], index: 2, kind: input, shape index: {}]   ;;  %s1321_s3 = inlined_call_operand.vmem [shape: f32[136,16], index: 3, kind: input, shape index: {}]   ;;  %s1322_s4 = inlined_call_operand.hbm [shape: f32[8,16], index: 4, kind: output, shape index: {}]  }
   0x1   :  { %10 = vsyncpa [#allocation4], 0  ;;  %s1120_s15 = smov [#allocation2]   ;;  %s1072_s19 = scalar_lea.hbm %s1319_s1, 8192 }
   0x2   :  { %s18_s16 = sshll.u32 %s1120_s15, 4  ;;  %p1073_p0 = scmp.ne.s32.totalorder %s1319_s1, %s1072_s19  ;;  %s19_s16 = int_to_ptr.vmem [resolvable:$true] %s18_s16 }
   0x3   :  { %p1076_p1 = scmp.lt.u32.totalorder %s1072_s19, %s1319_s1 }
   0x5   :  { %p1078_p2 = pnand %p1076_p1, %p1073_p0 }
   0x7   :  { %1081 = shalt.err (!%p1078_p2)
}
   0x8   :  { %s1082_s24 = scalar_lea.vmem %s19_s16, 8192  ;;  %p1087_p4 = scmp.lt.s32.totalorder %s19_s16, %s19_s16 }
   0x9   :  { %p1083_p3 = scmp.ne.s32.totalorder %s19_s16, %s1082_s24  ;;  %p1088_p5 = scmp.lt.s32.totalorder %s1082_s24, %s1082_s24 }
   0xb   :  { %p1089_p6 = por %p1088_p5, %p1087_p4 }
   0xd   :  { %p1090_p7 = pnand %p1089_p6, %p1083_p3 }
   0xf   :  { %1093 = shalt.err (!%p1090_p7)
}
  0x10   :  { %s1121_s25 = smov 128   ;;  %s1122_s26 = smov 8  }
  0x11   :  { %24 = dma.hbm_to_vmem [thread:$0]  %s1319_s1, 8192, %s19_s16, [#allocation3], %s1121_s25, %s1121_s25, %s1122_s26  }
  0x12   :  { %1116 = dma.done.wait [#allocation3], 8192  }
  0x13   :  { %1117 = vsyncadd [#allocation3], 4294959104  ;;  %v1123_v0 = vmov 0.0|0.0   ;;  %v1169_v1 = vld [vmem:[%s1318_s0] sm:$0xff]  ;;  %v62_v3 = vld [vmem:[#allocation2 + $0x8] sm:$0xff]  ;;  %vm1124_vm0 = vmmov 0  }
  0x14   :  { %911 = vmatprep.subr.bf16.mxu0 %v1123_v0  ;;  %935 = vmatprep.subr.bf16.mxu1 %v1123_v0  ;;  %v61_v2 = vld [vmem:[#allocation2] sm:$0xff]  ;;  %v39_v4 = vmul.f32 %v1169_v1, %v1169_v1  ;;  %v63_v6 = vld [vmem:[#allocation2 + $0x10] sm:$0xff]  ;;  %v64_v7 = vld [vmem:[#allocation2 + $0x18] sm:$0xff]  ;;  %v1125_v20 = vmov 0.0   ;;  %s1126_s24 = smov [#allocation5]   ;;  %vm624_vm6 = vcmask 130048  }
  0x15   :  { %37 = vadd.xlane.f32.xlu0 %v1169_v1  ;;  %v912_v5 = vpack.c.bf16 %v62_v3, %v61_v2  ;;  %v915_v8 = vpack.c.bf16 %v64_v7, %v63_v6  ;;  %v65_v9 = vld [vmem:[#allocation2 + $0x20] sm:$0xff]  ;;  %v66_v10 = vld [vmem:[#allocation2 + $0x28] sm:$0xff]  ;;  %v67_v12 = vld [vmem:[#allocation2 + $0x30] sm:$0xff]  ;;  %768 = vmatprep.mubr.msk.f32.mxu0 %vm1124_vm0, %v1125_v20  ;;  %s632_s25 = sshll.u32 %s1126_s24, 4  ;;  %s633_s25 = int_to_ptr.vmem [resolvable:$true] %s632_s25 }
  0x16   :  { %v918_v11 = vpack.c.bf16 %v66_v10, %v65_v9  ;;  %v68_v13 = vld [vmem:[#allocation2 + $0x38] sm:$0xff]  ;;  %v69_v15 = vld [vmem:[#allocation2 + $0x40] sm:$0xff]  ;;  %v70_v16 = vld [vmem:[#allocation2 + $0x48] sm:$0xff]  ;;  %803 = vmatprep.mubr.msk.f32.mxu1 %vm1124_vm0, %v1125_v20  ;;  %p1099_p9 = scmp.lt.s32.totalorder %s633_s25, %s633_s25 }
  0x17   :  { %913 = vmatpush3.bf16.msra.mxu0 %v912_v5  ;;  %v921_v14 = vpack.c.bf16 %v68_v13, %v67_v12  ;;  %v924_v17 = vpack.c.bf16 %v70_v16, %v69_v15  ;;  %v71_v18 = vld [vmem:[#allocation2 + $0x50] sm:$0xff]  ;;  %v72_v19 = vld [vmem:[#allocation2 + $0x58] sm:$0xff]  ;;  %v73_v22 = vld [vmem:[#allocation2 + $0x60] sm:$0xff] }
  0x18   :  { %914 = vmatprep.subr.bf16.mxu0 %v1123_v0  ;;  %v927_v21 = vpack.c.bf16 %v72_v19, %v71_v18  ;;  %v74_v23 = vld [vmem:[#allocation2 + $0x68] sm:$0xff]  ;;  %v75_v25 = vld [vmem:[#allocation2 + $0x70] sm:$0xff]  ;;  %v76_v26 = vld [vmem:[#allocation2 + $0x78] sm:$0xff] }
  0x19   :  { %40 = vadd.xlane.f32.xlu0 %v39_v4  ;;  %v930_v24 = vpack.c.bf16 %v74_v23, %v73_v22  ;;  %v933_v27 = vpack.c.bf16 %v76_v26, %v75_v25  ;;  %v641_v38 = vld [vmem:[%s1320_s2] ss:$0 sm:$0xff]  ;;  %v642_v40 = vld [vmem:[%s1320_s2 + $0x1] ss:$0 sm:$0xff]  ;;  %v170_v44 = vld [vmem:[#allocation2 + $0x88] sm:$0xff] }
  0x1a   :  { %v169_v43 = vld [vmem:[#allocation2 + $0x80] sm:$0xff]  ;;  %v171_v46 = vld [vmem:[#allocation2 + $0x90] sm:$0xff]  ;;  %v172_v47 = vld [vmem:[#allocation2 + $0x98] sm:$0xff] }
  0x1b   :  { %916 = vmatpush3.bf16.msra.mxu0 %v915_v8  ;;  %v936_v45 = vpack.c.bf16 %v170_v44, %v169_v43  ;;  %v939_v48 = vpack.c.bf16 %v172_v47, %v171_v46  ;;  %v173_v49 = vld [vmem:[#allocation2 + $0xa0] sm:$0xff]  ;;  %v174_v50 = vld [vmem:[#allocation2 + $0xa8] sm:$0xff]  ;;  %v175_v52 = vld [vmem:[#allocation2 + $0xb0] sm:$0xff] }
  0x1c   :  { %917 = vmatprep.subr.bf16.mxu0 %v1123_v0  ;;  %v942_v51 = vpack.c.bf16 %v174_v50, %v173_v49  ;;  %v176_v53 = vld [vmem:[#allocation2 + $0xb8] sm:$0xff]  ;;  %v177_v55 = vld [vmem:[#allocation2 + $0xc0] sm:$0xff]  ;;  %v178_v56 = vld [vmem:[#allocation2 + $0xc8] sm:$0xff] }
  0x1d   :  { %937 = vmatpush3.bf16.msra.mxu1 %v936_v45  ;;  %v945_v54 = vpack.c.bf16 %v176_v53, %v175_v52  ;;  %v948_v57 = vpack.c.bf16 %v178_v56, %v177_v55  ;;  %v179_v58 = vld [vmem:[#allocation2 + $0xd0] sm:$0xff]  ;;  %v180_v59 = vld [vmem:[#allocation2 + $0xd8] sm:$0xff]  ;;  %v181_v61 = vld [vmem:[#allocation2 + $0xe0] sm:$0xff] }
  0x1e   :  { %938 = vmatprep.subr.bf16.mxu1 %v1123_v0  ;;  %v951_v60 = vpack.c.bf16 %v180_v59, %v179_v58  ;;  %v182_v62 = vld [vmem:[#allocation2 + $0xe8] sm:$0xff]  ;;  %v183_v2 = vld [vmem:[#allocation2 + $0xf0] sm:$0xff]  ;;  %v184_v3 = vld [vmem:[#allocation2 + $0xf8] sm:$0xff] }
  0x1f   :  { %919 = vmatpush3.bf16.msra.mxu0 %v918_v11  ;;  %v954_v63 = vpack.c.bf16 %v182_v62, %v181_v61  ;;  %v957_v4 = vpack.c.bf16 %v184_v3, %v183_v2  ;;  %v643_v5 = vld [vmem:[%s1320_s2 + $0x2] ss:$0 sm:$0xff]  ;;  %v308_v50 = vld [vmem:[#allocation2 + $0x110] sm:$0xff] }
  0x20   :  { %920 = vmatprep.subr.bf16.mxu0 %v1123_v0  ;;  %v306_v26 = vld [vmem:[#allocation2 + $0x100] sm:$0xff]  ;;  %v312_v56 = vld [vmem:[#allocation2 + $0x130] sm:$0xff] }
  0x21   :  { %940 = vmatpush3.bf16.msra.mxu1 %v939_v48  ;;  %v310_v53 = vld [vmem:[#allocation2 + $0x120] sm:$0xff]  ;;  %v316_v62 = vld [vmem:[#allocation2 + $0x150] sm:$0xff] }
  0x22   :  { %941 = vmatprep.subr.bf16.mxu1 %v1123_v0  ;;  %v314_v59 = vld [vmem:[#allocation2 + $0x140] sm:$0xff] }
  0x23   :  { %922 = vmatpush3.bf16.msra.mxu0 %v921_v14  ;;  %v318_v3 = vld [vmem:[#allocation2 + $0x160] sm:$0xff] }
  0x24   :  { %923 = vmatprep.subr.bf16.mxu0 %v1123_v0 }
  0x25   :  { %943 = vmatpush3.bf16.msra.mxu1 %v942_v51  ;;  %v309_v51 = vld [vmem:[#allocation2 + $0x118] sm:$0xff] }
  0x26   :  { %944 = vmatprep.subr.bf16.mxu1 %v1123_v0  ;;  %v963_v52 = vpack.c.bf16 %v309_v51, %v308_v50 }
  0x27   :  { %925 = vmatpush3.bf16.msra.mxu0 %v924_v17 }
  0x28   :  { %926 = vmatprep.subr.bf16.mxu0 %v1123_v0 }
  0x29   :  { %946 = vmatpush3.bf16.msra.mxu1 %v945_v54  ;;  %v311_v54 = vld [vmem:[#allocation2 + $0x128] sm:$0xff] }
  0x2a   :  { %947 = vmatprep.subr.bf16.mxu1 %v1123_v0  ;;  %v966_v55 = vpack.c.bf16 %v311_v54, %v310_v53 }
  0x2b   :  { %928 = vmatpush3.bf16.msra.mxu0 %v927_v21 }
  0x2c   :  { %929 = vmatprep.subr.bf16.mxu0 %v1123_v0 }
  0x2d   :  { %949 = vmatpush3.bf16.msra.mxu1 %v948_v57  ;;  %v313_v57 = vld [vmem:[#allocation2 + $0x138] sm:$0xff] }
  0x2e   :  { %950 = vmatprep.subr.bf16.mxu1 %v1123_v0  ;;  %v969_v58 = vpack.c.bf16 %v313_v57, %v312_v56 }
  0x2f   :  { %931 = vmatpush3.bf16.msra.mxu0 %v930_v24 }
  0x30   :  { %932 = vmatprep.subr.bf16.mxu0 %v1123_v0 }
  0x31   :  { %952 = vmatpush3.bf16.msra.mxu1 %v951_v60  ;;  %v315_v60 = vld [vmem:[#allocation2 + $0x148] sm:$0xff] }
  0x32   :  { %953 = vmatprep.subr.bf16.mxu1 %v1123_v0  ;;  %v972_v61 = vpack.c.bf16 %v315_v60, %v314_v59 }
  0x33   :  { %934 = vmatpush3.bf16.msra.mxu0 %v933_v27  ;;  %v307_v27 = vld [vmem:[#allocation2 + $0x108] sm:$0xff] }
  0x34   :  { %959 = vmatprep.subr.bf16.mxu0 %v1123_v0 }
  0x35   :  { %955 = vmatpush3.bf16.msra.mxu1 %v954_v63  ;;  %v317_v63 = vld [vmem:[#allocation2 + $0x158] sm:$0xff] }
  0x36   :  { %956 = vmatprep.subr.bf16.mxu1 %v1123_v0  ;;  %v975_v2 = vpack.c.bf16 %v317_v63, %v316_v62 }
  0x39   :  { %958 = vmatpush3.bf16.msra.mxu1 %v957_v4  ;;  %v319_v4 = vld [vmem:[#allocation2 + $0x168] sm:$0xff] }
  0x3a   :  { %983 = vmatprep.subr.bf16.mxu1 %v1123_v0 }
  0xa2   :  { %v38_v28 = vpop.xlane.xlu0 %37 }
  0xa3   :  { %v42_v29 = vmul.f32 0.0078125, %v38_v28  ;;  %v960_v28 = vpack.c.bf16 %v307_v27, %v306_v26  ;;  %v415_v26 = vld [vmem:[#allocation2 + $0x188] sm:$0xff] }
  0xa5   :  { %v44_v31 = vmul.f32 %v42_v29, %v42_v29  ;;  %v47_v36 = vsub.f32 %v1169_v1, %v42_v29  ;;  %v644_v29 = vld [vmem:[%s1320_s2 + $0x3] ss:$0 sm:$0xff] }
  0xa6   :  { %v41_v30 = vpop.xlane.xlu0 %40 }
  0xa7   :  { %v43_v32 = vmul.f32 0.0078125, %v41_v30 }
  0xa9   :  { %v45_v33 = vsub.f32 %v43_v32, %v44_v31 }
  0xab   :  { %v46_v34 = vmax.f32 %v45_v33, 0.0 }
  0xad   :  { %v48_v35 = vadd.f32 1e-05, %v46_v34 }
  0xaf   :  { %1038 = vrsqrt.f32 %v48_v35 }
  0xb9   :  { %v1039_v37 = vpop.eup %1038 }
  0xba   :  { %v50_v39 = vmul.f32 %v1039_v37, %v47_v36 }
  0xbc   :  { %v55_v41 = vmul.f32 %v641_v38, %v50_v39 }
  0xbe   :  { %v60_v42 = vadd.f32 %v642_v40, %v55_v41 }
  0xc0   :  { %769 = vmatmul.mubr.f32.vlgmr.msra.gmra.mrb[0].mxu0 %v60_v42 }
  0xc1   :  { %838 = vmatprep.mubr.msk.f32.mxu0 %vm1124_vm0, %v1125_v20  ;;  %961 = vmatpush3.bf16.msra.mxu0 %v960_v28  ;;  %v416_v28 = vld [vmem:[#allocation2 + $0x190] sm:$0xff] }
  0xc2   :  { %962 = vmatprep.subr.bf16.mxu0 %v1123_v0 }
  0xc5   :  { %964 = vmatpush3.bf16.msra.mxu0 %v963_v52 }
  0xc6   :  { %965 = vmatprep.subr.bf16.mxu0 %v1123_v0 }
  0xc9   :  { %967 = vmatpush3.bf16.msra.mxu0 %v966_v55 }
  0xca   :  { %968 = vmatprep.subr.bf16.mxu0 %v1123_v0 }
  0xcd   :  { %970 = vmatpush3.bf16.msra.mxu0 %v969_v58 }
  0xce   :  { %971 = vmatprep.subr.bf16.mxu0 %v1123_v0 }
  0xd1   :  { %973 = vmatpush3.bf16.msra.mxu0 %v972_v61 }
  0xd2   :  { %974 = vmatprep.subr.bf16.mxu0 %v1123_v0 }
  0xd5   :  { %976 = vmatpush3.bf16.msra.mxu0 %v975_v2 }
  0xd6   :  { %977 = vmatprep.subr.bf16.mxu0 %v1123_v0 }
 0x193   :  { %v147_v6 = vpop.f32.mrb[0].mxu0 }
 0x194   :  { %v148_v7 = vadd.f32 %v643_v5, %v147_v6  ;;  %v770_v8 = vpop.f32.mrb[1].mxu0  ;;  %v978_v5 = vpack.c.bf16 %v319_v4, %v318_v3  ;;  %v320_v6 = vld [vmem:[#allocation2 + $0x170] sm:$0xff] }
 0x196   :  { %v152_v9 = vand.u32 2147483647, %v148_v7  ;;  %v151_v21 = vmax.f32 %v148_v7, 0.0  ;;  %979 = vmatpush3.bf16.msra.mxu0 %v978_v5 }
 0x197   :  { %980 = vmatprep.subr.bf16.mxu0 %v1123_v0 }
 0x198   :  { %v153_v10 = vsub.f32 0.0, %v152_v9 }
 0x19a   :  { %v154_v11 = vmul.f32 1.442695, %v153_v10 }
 0x19c   :  { %1040 = vpow2.f32 %v154_v11 }
 0x1a6   :  { %v1041_v12 = vpop.eup %1040 }
 0x1a7   :  { %v156_v13 = vadd.f32 1.0, %v1041_v12  ;;  %v159_v14 = vmul.f32 -0.5, %v1041_v12  ;;  %v162_v16 = vand.u32 2147483647, %v1041_v12 }
 0x1a9   :  { %1042 = vlog2.f32 %v156_v13  ;;  %v160_v15 = vadd.f32 1.0, %v159_v14  ;;  %vm163_vm1 = vcmp.lt.f32.partialorder %v162_v16, 0.0004427343 }
 0x1ab   :  { %v161_v19 = vmul.f32 %v1041_v12, %v160_v15 }
 0x1b3   :  { %v1043_v17 = vpop.eup %1042 }
 0x1b4   :  { %v158_v18 = vmul.f32 0.6931472, %v1043_v17 }
 0x1b6   :  { %v164_v22 = vsel %vm163_vm1, %v161_v19, %v158_v18  ;;  %v645_v19 = vld [vmem:[%s1320_s2 + $0x4] ss:$0 sm:$0xff] }
 0x1b7   :  { %v165_v23 = vadd.f32 %v164_v22, %v151_v21  ;;  %v646_v22 = vld [vmem:[%s1320_s2 + $0x5] ss:$0 sm:$0xff] }
 0x1b9   :  { %1044 = vtanh.f32 %v165_v23 }
 0x1c3   :  { %v1045_v24 = vpop.eup %1044 }
 0x1c4   :  { %v167_v25 = vmul.f32 %v1045_v24, %v148_v7  ;;  %v321_v7 = vld [vmem:[#allocation2 + $0x178] sm:$0xff] }
 0x1c5   :  { %v981_v8 = vpack.c.bf16 %v321_v7, %v320_v6  ;;  %v522_v6 = vld [vmem:[%s1321_s3] sm:$0xff]  ;;  %v523_v7 = vld [vmem:[%s1321_s3 + $0x8] sm:$0xff] }
 0x1c6   :  { %804 = vmatmul.mubr.f32.vlgmr.msra.gmra.mrb[0].mxu1 %v167_v25  ;;  %v414_v25 = vld [vmem:[#allocation2 + $0x180] sm:$0xff] }
 0x1c7   :  { %873 = vmatprep.mubr.msk.f32.mxu1 %vm1124_vm0, %v1125_v20  ;;  %982 = vmatpush3.bf16.msra.mxu0 %v981_v8  ;;  %v984_v27 = vpack.c.bf16 %v415_v26, %v414_v25  ;;  %v1008_v8 = vpack.c.bf16 %v523_v7, %v522_v6  ;;  %v534_v25 = vld [vmem:[%s1321_s3 + $0x60] sm:$0xff]  ;;  %v535_v26 = vld [vmem:[%s1321_s3 + $0x68] sm:$0xff] }
 0x1c8   :  { %1007 = vmatprep.subr.bf16.mxu0 %v1123_v0 }
 0x1c9   :  { %985 = vmatpush3.bf16.msra.mxu1 %v984_v27  ;;  %v1026_v27 = vpack.c.bf16 %v535_v26, %v534_v25 }
 0x1ca   :  { %986 = vmatprep.subr.bf16.mxu1 %v1123_v0 }
 0x299   :  { %v255_v30 = vpop.f32.mrb[0].mxu1 }
 0x29a   :  { %v256_v31 = vadd.f32 %v644_v29, %v255_v30  ;;  %v805_v32 = vpop.f32.mrb[1].mxu1  ;;  %v417_v29 = vld [vmem:[#allocation2 + $0x198] sm:$0xff] }
 0x29b   :  { %v987_v30 = vpack.c.bf16 %v417_v29, %v416_v28  ;;  %v419_v32 = vld [vmem:[#allocation2 + $0x1a8] sm:$0xff]  ;;  %v536_v28 = vld [vmem:[%s1321_s3 + $0x70] sm:$0xff]  ;;  %v537_v29 = vld [vmem:[%s1321_s3 + $0x78] sm:$0xff] }
 0x29c   :  { %v259_v33 = vadd.f32 %v256_v31, %v1169_v1  ;;  %v418_v31 = vld [vmem:[#allocation2 + $0x1a0] sm:$0xff] }
 0x29d   :  { %988 = vmatpush3.bf16.msra.mxu1 %v987_v30  ;;  %v1029_v30 = vpack.c.bf16 %v537_v29, %v536_v28 }
 0x29e   :  { %v261_v34 = vand.u32 2147483647, %v259_v33  ;;  %v260_v45 = vmax.f32 %v259_v33, 0.0  ;;  %989 = vmatprep.subr.bf16.mxu1 %v1123_v0 }
 0x2a0   :  { %v262_v35 = vsub.f32 0.0, %v261_v34  ;;  %v420_v34 = vld [vmem:[#allocation2 + $0x1b0] sm:$0xff] }
 0x2a2   :  { %v263_v36 = vmul.f32 1.442695, %v262_v35 }
 0x2a4   :  { %1046 = vpow2.f32 %v263_v36  ;;  %v422_v36 = vld [vmem:[#allocation2 + $0x1c0] sm:$0xff] }
 0x2ae   :  { %v1047_v37 = vpop.eup %1046 }
 0x2af   :  { %v265_v38 = vadd.f32 1.0, %v1047_v37  ;;  %v268_v39 = vmul.f32 -0.5, %v1047_v37  ;;  %v271_v41 = vand.u32 2147483647, %v1047_v37 }
 0x2b1   :  { %1048 = vlog2.f32 %v265_v38  ;;  %v269_v40 = vadd.f32 1.0, %v268_v39  ;;  %vm272_vm2 = vcmp.lt.f32.partialorder %v271_v41, 0.0004427343  ;;  %v424_v39 = vld [vmem:[#allocation2 + $0x1d0] sm:$0xff] }
 0x2b3   :  { %v270_v44 = vmul.f32 %v1047_v37, %v269_v40  ;;  %v423_v37 = vld [vmem:[#allocation2 + $0x1c8] sm:$0xff]  ;;  %v425_v40 = vld [vmem:[#allocation2 + $0x1d8] sm:$0xff] }
 0x2b4   :  { %v996_v38 = vpack.c.bf16 %v423_v37, %v422_v36  ;;  %v999_v41 = vpack.c.bf16 %v425_v40, %v424_v39 }
 0x2bb   :  { %v1049_v42 = vpop.eup %1048 }
 0x2bc   :  { %v267_v43 = vmul.f32 0.6931472, %v1049_v42  ;;  %v426_v42 = vld [vmem:[#allocation2 + $0x1e0] sm:$0xff] }
 0x2be   :  { %v273_v46 = vsel %vm272_vm2, %v270_v44, %v267_v43  ;;  %v427_v43 = vld [vmem:[#allocation2 + $0x1e8] sm:$0xff] }
 0x2bf   :  { %v274_v47 = vadd.f32 %v273_v46, %v260_v45  ;;  %v1002_v44 = vpack.c.bf16 %v427_v43, %v426_v42  ;;  %v428_v45 = vld [vmem:[#allocation2 + $0x1f0] sm:$0xff]  ;;  %v429_v46 = vld [vmem:[#allocation2 + $0x1f8] sm:$0xff] }
 0x2c1   :  { %1050 = vtanh.f32 %v274_v47  ;;  %v1005_v47 = vpack.c.bf16 %v429_v46, %v428_v45 }
 0x2cb   :  { %v1051_v48 = vpop.eup %1050 }
 0x2cc   :  { %v1213_v1 = vmul.f32 %v1051_v48, %v259_v33  ;;  %v990_v33 = vpack.c.bf16 %v419_v32, %v418_v31  ;;  %v647_v48 = vld [vmem:[%s1320_s2 + $0x6] ss:$0 sm:$0xff]  ;;  %v648_v31 = vld [vmem:[%s1320_s2 + $0x7] ss:$0 sm:$0xff] }
 0x2ce   :  { %281 = vadd.xlane.f32.xlu1 %v1213_v1  ;;  %v283_v49 = vmul.f32 %v1213_v1, %v1213_v1  ;;  %991 = vmatpush3.bf16.msra.mxu1 %v990_v33 }
 0x2cf   :  { %992 = vmatprep.subr.bf16.mxu1 %v1123_v0 }
 0x2d2   :  { %284 = vadd.xlane.f32.xlu1 %v283_v49 }
 0x35b   :  { %v282_v9 = vpop.xlane.xlu1 %281 }
 0x35c   :  { %v286_v10 = vmul.f32 0.0078125, %v282_v9  ;;  %v524_v9 = vld [vmem:[%s1321_s3 + $0x10] sm:$0xff] }
 0x35e   :  { %v288_v12 = vmul.f32 %v286_v10, %v286_v10  ;;  %v291_v17 = vsub.f32 %v1213_v1, %v286_v10  ;;  %v525_v10 = vld [vmem:[%s1321_s3 + $0x18] sm:$0xff] }
 0x35f   :  { %v285_v11 = vpop.xlane.xlu1 %284 }
 0x360   :  { %v287_v13 = vmul.f32 0.0078125, %v285_v11  ;;  %v1011_v11 = vpack.c.bf16 %v525_v10, %v524_v9 }
 0x362   :  { %v289_v14 = vsub.f32 %v287_v13, %v288_v12  ;;  %v526_v12 = vld [vmem:[%s1321_s3 + $0x20] sm:$0xff]  ;;  %v527_v13 = vld [vmem:[%s1321_s3 + $0x28] sm:$0xff] }
 0x364   :  { %v290_v15 = vmax.f32 %v289_v14, 0.0  ;;  %v1014_v14 = vpack.c.bf16 %v527_v13, %v526_v12 }
 0x366   :  { %v292_v16 = vadd.f32 1e-05, %v290_v15  ;;  %v528_v15 = vld [vmem:[%s1321_s3 + $0x30] sm:$0xff] }
 0x368   :  { %1052 = vrsqrt.f32 %v292_v16  ;;  %v529_v16 = vld [vmem:[%s1321_s3 + $0x38] sm:$0xff] }
 0x372   :  { %v1053_v18 = vpop.eup %1052 }
 0x373   :  { %v294_v21 = vmul.f32 %v1053_v18, %v291_v17  ;;  %v1017_v17 = vpack.c.bf16 %v529_v16, %v528_v15  ;;  %v530_v18 = vld [vmem:[%s1321_s3 + $0x40] sm:$0xff] }
 0x375   :  { %v299_v23 = vmul.f32 %v645_v19, %v294_v21  ;;  %v531_v19 = vld [vmem:[%s1321_s3 + $0x48] sm:$0xff] }
 0x376   :  { %v1020_v21 = vpack.c.bf16 %v531_v19, %v530_v18 }
 0x377   :  { %v304_v24 = vadd.f32 %v646_v22, %v299_v23  ;;  %v532_v22 = vld [vmem:[%s1321_s3 + $0x50] sm:$0xff]  ;;  %v533_v23 = vld [vmem:[%s1321_s3 + $0x58] sm:$0xff] }
 0x379   :  { %839 = vmatmul.mubr.f32.vlgmr.msra.gmra.mrb[2].mxu0 %v304_v24  ;;  %v1023_v24 = vpack.c.bf16 %v533_v23, %v532_v22 }
 0x37a   :  { %908 = vmatprep.mubr.msk.f32.mxu0 %vm1124_vm0, %v1125_v20  ;;  %v421_v20 = vld [vmem:[#allocation2 + $0x1b8] sm:$0xff]  ;;  %1009 = vmatpush3.bf16.msra.mxu0 %v1008_v8 }
 0x37b   :  { %v993_v35 = vpack.c.bf16 %v421_v20, %v420_v34  ;;  %1010 = vmatprep.subr.bf16.mxu0 %v1123_v0 }
 0x37d   :  { %994 = vmatpush3.bf16.msra.mxu1 %v993_v35 }
 0x37e   :  { %995 = vmatprep.subr.bf16.mxu1 %v1123_v0  ;;  %1012 = vmatpush3.bf16.msra.mxu0 %v1011_v11 }
 0x37f   :  { %1013 = vmatprep.subr.bf16.mxu0 %v1123_v0 }
 0x381   :  { %997 = vmatpush3.bf16.msra.mxu1 %v996_v38 }
 0x382   :  { %998 = vmatprep.subr.bf16.mxu1 %v1123_v0  ;;  %1015 = vmatpush3.bf16.msra.mxu0 %v1014_v14 }
 0x383   :  { %1016 = vmatprep.subr.bf16.mxu0 %v1123_v0 }
 0x385   :  { %1000 = vmatpush3.bf16.msra.mxu1 %v999_v41 }
 0x386   :  { %1001 = vmatprep.subr.bf16.mxu1 %v1123_v0  ;;  %1018 = vmatpush3.bf16.msra.mxu0 %v1017_v17 }
 0x387   :  { %1019 = vmatprep.subr.bf16.mxu0 %v1123_v0 }
 0x389   :  { %1003 = vmatpush3.bf16.msra.mxu1 %v1002_v44 }
 0x38a   :  { %1004 = vmatprep.subr.bf16.mxu1 %v1123_v0  ;;  %1021 = vmatpush3.bf16.msra.mxu0 %v1020_v21 }
 0x38b   :  { %1022 = vmatprep.subr.bf16.mxu0 %v1123_v0 }
 0x38d   :  { %1006 = vmatpush3.bf16.msra.mxu1 %v1005_v47 }
 0x38e   :  { %1024 = vmatpush3.bf16.msra.mxu0 %v1023_v24 }
 0x38f   :  { %1025 = vmatprep.subr.bf16.mxu0 %v1123_v0 }
 0x392   :  { %1027 = vmatpush3.bf16.msra.mxu0 %v1026_v27 }
 0x393   :  { %1028 = vmatprep.subr.bf16.mxu0 %v1123_v0 }
 0x396   :  { %1030 = vmatpush3.bf16.msra.mxu0 %v1029_v30 }
 0x44c   :  { %v392_v49 = vpop.f32.mrb[2].mxu0 }
 0x44d   :  { %v393_v50 = vadd.f32 %v647_v48, %v392_v49  ;;  %v840_v51 = vpop.f32.mrb[3].mxu0  ;;  %v649_v49 = vld [vmem:[%s1321_s3 + $0x80] ss:$0 sm:$0xff]  ;;  %s1094_s3 = scalar_lea.vmem %s633_s25, 128 }
 0x44e   :  { %p1095_p8 = scmp.ne.s32.totalorder %s633_s25, %s1094_s3  ;;  %p1100_p10 = scmp.lt.s32.totalorder %s1094_s3, %s1094_s3 }
 0x44f   :  { %v397_v52 = vand.u32 2147483647, %v393_v50  ;;  %v396_v63 = vmax.f32 %v393_v50, 0.0 }
 0x450   :  { %p1101_p11 = por %p1100_p10, %p1099_p9 }
 0x451   :  { %v398_v53 = vsub.f32 0.0, %v397_v52 }
 0x452   :  { %p1102_p12 = pnand %p1101_p11, %p1095_p8 }
 0x453   :  { %v399_v54 = vmul.f32 1.442695, %v398_v53 }
 0x455   :  { %1054 = vpow2.f32 %v399_v54 }
 0x45f   :  { %v1055_v55 = vpop.eup %1054 }
 0x460   :  { %v401_v56 = vadd.f32 1.0, %v1055_v55  ;;  %v404_v57 = vmul.f32 -0.5, %v1055_v55  ;;  %v407_v59 = vand.u32 2147483647, %v1055_v55 }
 0x462   :  { %1056 = vlog2.f32 %v401_v56  ;;  %v405_v58 = vadd.f32 1.0, %v404_v57  ;;  %vm408_vm3 = vcmp.lt.f32.partialorder %v407_v59, 0.0004427343  ;;  %v613_v56 = vlaneseq }
 0x464   :  { %v406_v62 = vmul.f32 %v1055_v55, %v405_v58  ;;  %v614_v57 = vand.u32 127, %v613_v56 }
 0x466   :  { %vm615_vm5 = vcmp.lt.s32.totalorder %v614_v57, 8 }
 0x46c   :  { %v1057_v60 = vpop.eup %1056 }
 0x46d   :  { %v403_v61 = vmul.f32 0.6931472, %v1057_v60 }
 0x46f   :  { %v409_v2 = vsel %vm408_vm3, %v406_v62, %v403_v61 }
 0x470   :  { %v410_v3 = vadd.f32 %v409_v2, %v396_v63 }
 0x472   :  { %1058 = vtanh.f32 %v410_v3 }
 0x47c   :  { %v1059_v4 = vpop.eup %1058 }
 0x47d   :  { %v412_v5 = vmul.f32 %v1059_v4, %v393_v50 }
 0x47f   :  { %874 = vmatmul.mubr.f32.vlgmr.msra.gmra.mrb[2].mxu1 %v412_v5 }
 0x552   :  { %v500_v32 = vpop.f32.mrb[2].mxu1 }
 0x553   :  { %v501_v33 = vadd.f32 %v648_v31, %v500_v32  ;;  %v875_v34 = vpop.f32.mrb[3].mxu1 }
 0x555   :  { %v504_v20 = vadd.f32 %v501_v33, %v1213_v1 }
 0x557   :  { %v506_v0 = vand.u32 2147483647, %v504_v20  ;;  %v505_v45 = vmax.f32 %v504_v20, 0.0 }
 0x559   :  { %v507_v35 = vsub.f32 0.0, %v506_v0 }
 0x55b   :  { %v508_v36 = vmul.f32 1.442695, %v507_v35 }
 0x55d   :  { %1060 = vpow2.f32 %v508_v36 }
 0x567   :  { %v1061_v37 = vpop.eup %1060 }
 0x568   :  { %v510_v38 = vadd.f32 1.0, %v1061_v37  ;;  %v513_v39 = vmul.f32 -0.5, %v1061_v37  ;;  %v516_v41 = vand.u32 2147483647, %v1061_v37 }
 0x56a   :  { %1062 = vlog2.f32 %v510_v38  ;;  %v514_v40 = vadd.f32 1.0, %v513_v39  ;;  %vm517_vm4 = vcmp.lt.f32.partialorder %v516_v41, 0.0004427343 }
 0x56c   :  { %v515_v44 = vmul.f32 %v1061_v37, %v514_v40 }
 0x574   :  { %v1063_v42 = vpop.eup %1062 }
 0x575   :  { %v512_v43 = vmul.f32 0.6931472, %v1063_v42 }
 0x577   :  { %v518_v46 = vsel %vm517_vm4, %v515_v44, %v512_v43 }
 0x578   :  { %v519_v47 = vadd.f32 %v518_v46, %v505_v45 }
 0x57a   :  { %1064 = vtanh.f32 %v519_v47 }
 0x584   :  { %v1065_v48 = vpop.eup %1064 }
 0x585   :  { %v521_v1 = vmul.f32 %v1065_v48, %v504_v20 }
 0x587   :  { %909 = vmatmul.mubr.f32.vlgmr.msra.gmra.mrb[4].mxu0 %v521_v1 }
 0x65a   :  { %v609_v50 = vpop.f32.mrb[4].mxu0 }
 0x65b   :  { %v610_v51 = vadd.f32 %v649_v49, %v609_v50  ;;  %v910_v52 = vpop.f32.mrb[5].mxu0 }
 0x65d   :  { %v650_v53 = vmul.f32 -1.442695, %v610_v51 }
 0x65f   :  { %1066 = vpow2.f32 %v650_v53 }
 0x660   :  { %1068 = vtanh.f32 %v610_v51 }
 0x669   :  { %v1067_v54 = vpop.eup %1066 }
 0x66a   :  { %v620_v55 = vadd.f32 1.0, %v1067_v54  ;;  %v1069_v58 = vpop.eup %1068 }
 0x66c   :  { %1070 = vrcp.f32 %v620_v55 }
 0x676   :  { %v1071_v59 = vpop.eup %1070 }
 0x677   :  { %v623_v60 = vsel %vm615_vm5, %v1069_v58, %v1071_v59 }
 0x678   :  { %625 = vst.msk [vmem:[#allocation5] sm:$0xff] %vm624_vm6, %v623_v60 }
 0x679   :  { %1105 = shalt.err (!%p1102_p12)
}
 0x67a   :  { %s1106_s28 = scalar_lea.hbm %s1322_s4, 128 }
 0x67b   :  { %p1107_p13 = scmp.ne.s32.totalorder %s1322_s4, %s1106_s28  ;;  %p1110_p0 = scmp.lt.u32.totalorder %s1106_s28, %s1322_s4 }
 0x67d   :  { %p1112_p1 = pnand %p1110_p0, %p1107_p13 }
 0x67f   :  { %1115 = shalt.err (!%p1112_p1)
}
 0x680   :  { %635 = dma.vmem_to_hbm [thread:$0]  %s633_s25, 128, %s1322_s4, [#allocation4]  }
 0x681   :  { %1118 = dma.done.wait [#allocation4], 128  }
 0x682   :  { %1119 = vsyncadd [#allocation4], 4294967168 }
 0x683   :  { %639 = vsyncpa [#allocation3], 1 }
 0x684   :  { %640 = vsyncpa [#allocation4], 1 }

</bundles_post_ra>
